<compile_context>
chip_gen: v6e
topology: v6e:2x2x1
jax: 0.10.0
libtpu: 0.0.40
codegen_flags: <defaults>
</compile_context>

<pallas_src>
import functools

import numpy as np
import jax
import jax.numpy as jnp
from jax.experimental import pallas as pl
from jax.experimental.pallas import tpu as pltpu


def _round_up(x, m):
    return (x + m - 1) // m * m


def cb_loss_kernel(x_ref, t_ref, loss_ref, *, gamma, class_weights,
                   num_classes, fold):
    # Grid: (split, tile).  The output block is indexed only by `split`, so it
    # stays VMEM-resident across the inner "arbitrary" tile axis and acts as a
    # per-split accumulator.
    i = pl.program_id(1)

    @pl.when(i == 0)
    def _init():
        loss_ref[...] = jnp.zeros_like(loss_ref)

    t = t_ref[...]                                   # [8, TNL] int32, -1 = pad

    # Per-sample class-balanced weight from compile-time constants.  Padded
    # columns (t == -1) keep weight 0 and contribute nothing to the sum.
    w = jnp.zeros(t.shape, jnp.float32)
    for c in range(num_classes):
        w = jnp.where(t == c, jnp.float32(class_weights[c]), w)

    use_int_gamma = (gamma > 0.0) and float(gamma).is_integer() and gamma <= 8.0

    # acc = sum over classes of modulator * BCE  (per sample).
    acc = jnp.zeros(t.shape, jnp.float32)
    for c in range(num_classes):
        x = x_ref[pl.ds(fold * c, fold), :]          # [8, TNL] class-c logits
        z = t == c                                   # one-hot membership
        e = jnp.exp(-jnp.abs(x))                     # EUP #1
        lg = jnp.log1p(e)                            # EUP #2
        sp = jnp.maximum(x, 0.0) - x + lg            # log(1+exp(-x)), stable
        # binary_cross_entropy_with_logits (reduction='none'):
        #   max(x,0) - x*z + log1p(exp(-|x|)) == sp + (0 if z else x)
        bce = sp + jnp.where(z, 0.0, x)

        if gamma == 0.0:
            acc = acc + bce
        elif use_int_gamma:
            # exp(-g*z*x - g*log(1+exp(-x))) == (z ? 1-sigmoid(x) : sigmoid(x))**g
            # sigmoid(x) built from e = exp(-|x|): no extra EUP exp, one
            # full-precision reciprocal (approx rcp would risk the 1e-5 rtol).
            denom = 1.0 + e
            inv = pl.reciprocal(denom, approx=False)
            s = jnp.where(x >= 0.0, 1.0, e) * inv    # = sigmoid(x)
            m1 = jnp.where(z, 1.0 - s, s)            # focal base (1 - p_t)
            mod = m1
            for _ in range(int(gamma) - 1):
                mod = mod * m1                       # m1 ** gamma
            acc = acc + mod * bce
        else:
            # non-integer gamma: single extra exp
            mod = jnp.exp(-gamma * (jnp.where(z, x, 0.0) + sp))
            acc = acc + mod * bce

    weighted = w * acc                               # [8, TNL]
    # Lane axis first (VALU vreg accumulate + one cross-lane reduce), then the
    # 8 sublanes of the single remaining vreg.
    tile_loss = jnp.sum(jnp.sum(weighted, axis=1, keepdims=True))
    loss_ref[...] += tile_loss                       # broadcast into (1,8,128)


@functools.partial(jax.jit,
                   static_argnames=("gamma", "beta", "samples_per_cls",
                                    "no_of_classes"))
def cb_loss(inputs, targets, *, gamma=2.0, beta=0.999,
            samples_per_cls=(3601, 926, 5345), no_of_classes=3):
    N, C = inputs.shape
    assert C == no_of_classes

    # Class-balanced weights: deterministic numpy -> compile-time constants.
    effective_num = 1.0 - np.power(beta, np.asarray(samples_per_cls,
                                                    dtype=np.float64))
    wts = (1.0 - beta) / effective_num
    wts = wts / np.sum(wts) * no_of_classes
    class_weights = tuple(float(v) for v in wts)

    SUB = 8                   # f32 sublanes per vreg (fold factor)
    LANE = 128
    NUM_SPLITS = 2            # leading "parallel" axis: 2 TCs on v7x
    TNL_MAX = 64 * 1024       # folded lanes per tile = 512K samples
                              #   -> 6 MiB logits + 2 MiB targets per step

    n_lanes = pl.cdiv(N, SUB)
    per_split = pl.cdiv(n_lanes, NUM_SPLITS)
    tnl = min(TNL_MAX, _round_up(max(per_split, 1), LANE))
    tiles_per_split = pl.cdiv(per_split, tnl)
    lanes_pad = NUM_SPLITS * tiles_per_split * tnl
    n_pad = SUB * lanes_pad

    # Sublane-folded, lane-dense layout (one fused transpose+pad XLA pass):
    #   x: [N, C] -> [C, N_pad] -> [C*8, N_pad/8]  (class c = rows 8c..8c+7)
    #   t: [N]    -> [N_pad]    -> [8, N_pad/8]    (pad value -1)
    # Sample n lives at (sublane s, lane l) with n = s*lanes_pad + l.
    x = jnp.pad(jnp.transpose(inputs.astype(jnp.float32)),
                ((0, 0), (0, n_pad - N))).reshape(C * SUB, lanes_pad)
    t = jnp.pad(targets.astype(jnp.int32), (0, n_pad - N),
                constant_values=-1).reshape(SUB, lanes_pad)

    kernel = functools.partial(cb_loss_kernel, gamma=float(gamma),
                               class_weights=class_weights,
                               num_classes=no_of_classes, fold=SUB)

    loss_parts = pl.pallas_call(
        kernel,
        grid=(NUM_SPLITS, tiles_per_split),
        in_specs=[
            pl.BlockSpec((C * SUB, tnl),
                         lambda s, i: (0, s * tiles_per_split + i)),
            pl.BlockSpec((SUB, tnl),
                         lambda s, i: (0, s * tiles_per_split + i)),
        ],
        out_specs=pl.BlockSpec((1, SUB, LANE), lambda s, i: (s, 0, 0)),
        out_shape=jax.ShapeDtypeStruct((NUM_SPLITS, SUB, LANE), jnp.float32),
        compiler_params=pltpu.CompilerParams(
            dimension_semantics=("parallel", "arbitrary"),
            vmem_limit_bytes=32 * 1024 * 1024),
    )(x, t)

    total = jnp.sum(loss_parts[:, 0, 0])
    # Matches torch: focal_loss /= torch.sum(targets) (sum of integer labels).
    return total / jnp.sum(targets).astype(jnp.float32)


def cb_loss_ref(inputs, targets, *, gamma=2.0, beta=0.999,
                samples_per_cls=(3601, 926, 5345), no_of_classes=3):
    # Pure-JAX reference mirroring the PyTorch forward.
    effective_num = 1.0 - np.power(beta, np.asarray(samples_per_cls,
                                                    dtype=np.float64))
    weights = (1.0 - beta) / effective_num
    weights = weights / np.sum(weights) * no_of_classes
    cw = jnp.asarray(weights, dtype=jnp.float32)

    z = jax.nn.one_hot(targets, no_of_classes, dtype=jnp.float32)
    x = inputs.astype(jnp.float32)
    w = jnp.sum(cw[None, :] * z, axis=1, keepdims=True)
    bce = jnp.maximum(x, 0.0) - x * z + jnp.log1p(jnp.exp(-jnp.abs(x)))
    if gamma == 0.0:
        mod = 1.0
    else:
        mod = jnp.exp(-gamma * z * x - gamma * jnp.log(1.0 + jnp.exp(-x)))
    loss = jnp.sum(w * mod * bce)
    return loss / jnp.sum(targets).astype(jnp.float32)


if __name__ == "__main__":
    key = jax.random.PRNGKey(0)
    k1, k2 = jax.random.split(key)
    N, C = 512, 3
    inputs = jax.random.normal(k1, (N, C), dtype=jnp.float32)       # logits [N, C]
    targets = jax.random.randint(k2, (N,), 0, C, dtype=jnp.int32)   # labels [N]

    out = jax.block_until_ready(cb_loss(inputs, targets))
    ref = jax.block_until_ready(cb_loss_ref(inputs, targets))
    np.testing.assert_allclose(np.asarray(out), np.asarray(ref),
                               rtol=1e-5, atol=1e-6)

    print("KERNEL_OK")
</pallas_src>

<mosaic_0001>
module attributes {stable_mosaic.version = 11 : i64} {
  func.func @cb_loss_kernel(%arg0: i32, %arg1: i32, %arg2: memref<24x128xf32, #tpu.memory_space<vmem>>, %arg3: memref<8x128xi32, #tpu.memory_space<vmem>>, %arg4: memref<1x8x128xf32, #tpu.memory_space<vmem>>) attributes {dimension_semantics = [#tpu.dimension_semantics<parallel>, #tpu.dimension_semantics<arbitrary>], iteration_bounds = array<i64: 2, 1>, scalar_prefetch = 0 : i64, scratch_operands = 0 : i64, tpu.core_type = #tpu.core_type<tc>, window_params = [{transform_indices = @transform_0, window_bounds = array<i64: 24, 128>}, {transform_indices = @transform_1, window_bounds = array<i64: 8, 128>}, {transform_indices = @transform_2, window_bounds = array<i64: 1, 8, 128>}]} {
    %c0_i32 = arith.constant 0 : i32
    %0 = arith.cmpi eq, %arg1, %c0_i32 : i32
    %1 = arith.extui %0 : i1 to i32
    %c0_i32_0 = arith.constant 0 : i32
    %2 = arith.cmpi ne, %1, %c0_i32_0 : i32
    scf.if %2 {
      %cst_43 = arith.constant 0.000000e+00 : f32
      %116 = vector.broadcast %cst_43 : f32 to vector<1x8x128xf32>
      %c0_44 = arith.constant 0 : index
      %c0_45 = arith.constant 0 : index
      %c0_46 = arith.constant 0 : index
      %117 = vector.load %arg4[%c0_44, %c0_45, %c0_46] : memref<1x8x128xf32, #tpu.memory_space<vmem>>, vector<1x8x128xf32>
      tpu.vector_store %arg4[%c0_44, %c0_45, %c0_46], %116 {strides = array<i32>} : memref<1x8x128xf32, #tpu.memory_space<vmem>>, vector<1x8x128xf32>,
    } else {
    }
    %c0 = arith.constant 0 : index
    %c0_1 = arith.constant 0 : index
    %3 = vector.load %arg3[%c0, %c0_1] : memref<8x128xi32, #tpu.memory_space<vmem>>, vector<8x128xi32>
    %cst = arith.constant 0.000000e+00 : f32
    %4 = vector.broadcast %cst : f32 to vector<8x128xf32>
    %c0_i32_2 = arith.constant 0 : i32
    %5 = vector.broadcast %c0_i32_2 : i32 to vector<8x128xi32>
    %6 = arith.cmpi eq, %3, %5 : vector<8x128xi32>
    %cst_3 = arith.constant 0.836168646 : f32
    %7 = vector.broadcast %cst_3 : f32 to vector<8x128xf32>
    %8 = arith.select %6, %7, %4 : vector<8x128xi1>, vector<8x128xf32>
    %c1_i32 = arith.constant 1 : i32
    %9 = vector.broadcast %c1_i32 : i32 to vector<8x128xi32>
    %10 = arith.cmpi eq, %3, %9 : vector<8x128xi32>
    %cst_4 = arith.constant 1.34655654 : f32
    %11 = vector.broadcast %cst_4 : f32 to vector<8x128xf32>
    %12 = arith.select %10, %11, %8 : vector<8x128xi1>, vector<8x128xf32>
    %c2_i32 = arith.constant 2 : i32
    %13 = vector.broadcast %c2_i32 : i32 to vector<8x128xi32>
    %14 = arith.cmpi eq, %3, %13 : vector<8x128xi32>
    %cst_5 = arith.constant 0.817274868 : f32
    %15 = vector.broadcast %cst_5 : f32 to vector<8x128xf32>
    %16 = arith.select %14, %15, %12 : vector<8x128xi1>, vector<8x128xf32>
    %cst_6 = arith.constant 0.000000e+00 : f32
    %17 = vector.broadcast %cst_6 : f32 to vector<8x128xf32>
    %c0_7 = arith.constant 0 : index
    %c0_8 = arith.constant 0 : index
    %18 = vector.load %arg2[%c0_7, %c0_8] : memref<24x128xf32, #tpu.memory_space<vmem>>, vector<8x128xf32>
    %c0_i32_9 = arith.constant 0 : i32
    %19 = vector.broadcast %c0_i32_9 : i32 to vector<8x128xi32>
    %20 = arith.cmpi eq, %3, %19 : vector<8x128xi32>
    %21 = math.absf %18 : vector<8x128xf32>
    %cst_10 = arith.constant 0.000000e+00 : f32
    %22 = vector.broadcast %cst_10 : f32 to vector<8x128xf32>
    %23 = arith.subf %22, %21 : vector<8x128xf32>
    %24 = math.exp %23 : vector<8x128xf32>
    %25 = math.log1p %24 : vector<8x128xf32>
    %cst_11 = arith.constant 0.000000e+00 : f32
    %26 = vector.broadcast %cst_11 : f32 to vector<8x128xf32>
    %27 = arith.maximumf %18, %26 : vector<8x128xf32>
    %28 = arith.subf %27, %18 : vector<8x128xf32>
    %29 = arith.addf %28, %25 : vector<8x128xf32>
    %cst_12 = arith.constant 0.000000e+00 : f32
    %30 = vector.broadcast %cst_12 : f32 to vector<8x128xf32>
    %31 = arith.select %20, %30, %18 : vector<8x128xi1>, vector<8x128xf32>
    %32 = arith.addf %29, %31 : vector<8x128xf32>
    %cst_13 = arith.constant 1.000000e+00 : f32
    %33 = vector.broadcast %cst_13 : f32 to vector<8x128xf32>
    %34 = arith.addf %33, %24 : vector<8x128xf32>
    %35 = tpu.reciprocal %34 : vector<8x128xf32> -> vector<8x128xf32>
    %cst_14 = arith.constant 0.000000e+00 : f32
    %36 = vector.broadcast %cst_14 : f32 to vector<8x128xf32>
    %37 = arith.cmpf oge, %18, %36 : vector<8x128xf32>
    %cst_15 = arith.constant 1.000000e+00 : f32
    %38 = vector.broadcast %cst_15 : f32 to vector<8x128xf32>
    %39 = arith.select %37, %38, %24 : vector<8x128xi1>, vector<8x128xf32>
    %40 = arith.mulf %39, %35 : vector<8x128xf32>
    %cst_16 = arith.constant 1.000000e+00 : f32
    %41 = vector.broadcast %cst_16 : f32 to vector<8x128xf32>
    %42 = arith.subf %41, %40 : vector<8x128xf32>
    %43 = arith.select %20, %42, %40 : vector<8x128xi1>, vector<8x128xf32>
    %44 = arith.mulf %43, %43 : vector<8x128xf32>
    %45 = arith.mulf %44, %32 : vector<8x128xf32>
    %46 = arith.addf %17, %45 : vector<8x128xf32>
    %c8 = arith.constant 8 : index
    %c0_17 = arith.constant 0 : index
    %47 = vector.load %arg2[%c8, %c0_17] : memref<24x128xf32, #tpu.memory_space<vmem>>, vector<8x128xf32>
    %c1_i32_18 = arith.constant 1 : i32
    %48 = vector.broadcast %c1_i32_18 : i32 to vector<8x128xi32>
    %49 = arith.cmpi eq, %3, %48 : vector<8x128xi32>
    %50 = math.absf %47 : vector<8x128xf32>
    %cst_19 = arith.constant 0.000000e+00 : f32
    %51 = vector.broadcast %cst_19 : f32 to vector<8x128xf32>
    %52 = arith.subf %51, %50 : vector<8x128xf32>
    %53 = math.exp %52 : vector<8x128xf32>
    %54 = math.log1p %53 : vector<8x128xf32>
    %cst_20 = arith.constant 0.000000e+00 : f32
    %55 = vector.broadcast %cst_20 : f32 to vector<8x128xf32>
    %56 = arith.maximumf %47, %55 : vector<8x128xf32>
    %57 = arith.subf %56, %47 : vector<8x128xf32>
    %58 = arith.addf %57, %54 : vector<8x128xf32>
    %cst_21 = arith.constant 0.000000e+00 : f32
    %59 = vector.broadcast %cst_21 : f32 to vector<8x128xf32>
    %60 = arith.select %49, %59, %47 : vector<8x128xi1>, vector<8x128xf32>
    %61 = arith.addf %58, %60 : vector<8x128xf32>
    %cst_22 = arith.constant 1.000000e+00 : f32
    %62 = vector.broadcast %cst_22 : f32 to vector<8x128xf32>
    %63 = arith.addf %62, %53 : vector<8x128xf32>
    %64 = tpu.reciprocal %63 : vector<8x128xf32> -> vector<8x128xf32>
    %cst_23 = arith.constant 0.000000e+00 : f32
    %65 = vector.broadcast %cst_23 : f32 to vector<8x128xf32>
    %66 = arith.cmpf oge, %47, %65 : vector<8x128xf32>
    %cst_24 = arith.constant 1.000000e+00 : f32
    %67 = vector.broadcast %cst_24 : f32 to vector<8x128xf32>
    %68 = arith.select %66, %67, %53 : vector<8x128xi1>, vector<8x128xf32>
    %69 = arith.mulf %68, %64 : vector<8x128xf32>
    %cst_25 = arith.constant 1.000000e+00 : f32
    %70 = vector.broadcast %cst_25 : f32 to vector<8x128xf32>
    %71 = arith.subf %70, %69 : vector<8x128xf32>
    %72 = arith.select %49, %71, %69 : vector<8x128xi1>, vector<8x128xf32>
    %73 = arith.mulf %72, %72 : vector<8x128xf32>
    %74 = arith.mulf %73, %61 : vector<8x128xf32>
    %75 = arith.addf %46, %74 : vector<8x128xf32>
    %c16 = arith.constant 16 : index
    %c0_26 = arith.constant 0 : index
    %76 = vector.load %arg2[%c16, %c0_26] : memref<24x128xf32, #tpu.memory_space<vmem>>, vector<8x128xf32>
    %c2_i32_27 = arith.constant 2 : i32
    %77 = vector.broadcast %c2_i32_27 : i32 to vector<8x128xi32>
    %78 = arith.cmpi eq, %3, %77 : vector<8x128xi32>
    %79 = math.absf %76 : vector<8x128xf32>
    %cst_28 = arith.constant 0.000000e+00 : f32
    %80 = vector.broadcast %cst_28 : f32 to vector<8x128xf32>
    %81 = arith.subf %80, %79 : vector<8x128xf32>
    %82 = math.exp %81 : vector<8x128xf32>
    %83 = math.log1p %82 : vector<8x128xf32>
    %cst_29 = arith.constant 0.000000e+00 : f32
    %84 = vector.broadcast %cst_29 : f32 to vector<8x128xf32>
    %85 = arith.maximumf %76, %84 : vector<8x128xf32>
    %86 = arith.subf %85, %76 : vector<8x128xf32>
    %87 = arith.addf %86, %83 : vector<8x128xf32>
    %cst_30 = arith.constant 0.000000e+00 : f32
    %88 = vector.broadcast %cst_30 : f32 to vector<8x128xf32>
    %89 = arith.select %78, %88, %76 : vector<8x128xi1>, vector<8x128xf32>
    %90 = arith.addf %87, %89 : vector<8x128xf32>
    %cst_31 = arith.constant 1.000000e+00 : f32
    %91 = vector.broadcast %cst_31 : f32 to vector<8x128xf32>
    %92 = arith.addf %91, %82 : vector<8x128xf32>
    %93 = tpu.reciprocal %92 : vector<8x128xf32> -> vector<8x128xf32>
    %cst_32 = arith.constant 0.000000e+00 : f32
    %94 = vector.broadcast %cst_32 : f32 to vector<8x128xf32>
    %95 = arith.cmpf oge, %76, %94 : vector<8x128xf32>
    %cst_33 = arith.constant 1.000000e+00 : f32
    %96 = vector.broadcast %cst_33 : f32 to vector<8x128xf32>
    %97 = arith.select %95, %96, %82 : vector<8x128xi1>, vector<8x128xf32>
    %98 = arith.mulf %97, %93 : vector<8x128xf32>
    %cst_34 = arith.constant 1.000000e+00 : f32
    %99 = vector.broadcast %cst_34 : f32 to vector<8x128xf32>
    %100 = arith.subf %99, %98 : vector<8x128xf32>
    %101 = arith.select %78, %100, %98 : vector<8x128xi1>, vector<8x128xf32>
    %102 = arith.mulf %101, %101 : vector<8x128xf32>
    %103 = arith.mulf %102, %90 : vector<8x128xf32>
    %104 = arith.addf %75, %103 : vector<8x128xf32>
    %105 = arith.mulf %16, %104 : vector<8x128xf32>
    %cst_35 = arith.constant dense<0.000000e+00> : vector<8xf32>
    %106 = vector.multi_reduction <add>, %105, %cst_35 [1] : vector<8x128xf32> to vector<8xf32>
    %107 = vector.shape_cast %106 : vector<8xf32> to vector<8x1xf32>
    %108 = vector.shape_cast %107 : vector<8x1xf32> to vector<1x8x1xf32>
    %cst_36 = arith.constant dense<0.000000e+00> : vector<1xf32>
    %109 = vector.multi_reduction <add>, %108, %cst_36 [1, 2] : vector<1x8x1xf32> to vector<1xf32>
    %110 = vector.shape_cast %109 : vector<1xf32> to vector<1x1x1xf32>
    %111 = vector.extract %110[0, 0, 0] : f32 from vector<1x1x1xf32>
    %c0_37 = arith.constant 0 : index
    %c0_38 = arith.constant 0 : index
    %c0_39 = arith.constant 0 : index
    %112 = vector.load %arg4[%c0_37, %c0_38, %c0_39] : memref<1x8x128xf32, #tpu.memory_space<vmem>>, vector<1x8x128xf32>
    %113 = vector.broadcast %111 : f32 to vector<1x8x128xf32>
    %114 = arith.addf %112, %113 : vector<1x8x128xf32>
    %c0_40 = arith.constant 0 : index
    %c0_41 = arith.constant 0 : index
    %c0_42 = arith.constant 0 : index
    %115 = vector.load %arg4[%c0_40, %c0_41, %c0_42] : memref<1x8x128xf32, #tpu.memory_space<vmem>>, vector<1x8x128xf32>
    tpu.vector_store %arg4[%c0_40, %c0_41, %c0_42], %114 {strides = array<i32>} : memref<1x8x128xf32, #tpu.memory_space<vmem>>, vector<1x8x128xf32>,
    return
  }
  func.func @transform_0(%arg0: i32, %arg1: i32) -> (i32, i32) {
    %c1_i32 = arith.constant 1 : i32
    %0 = arith.muli %arg0, %c1_i32 : i32
    %1 = arith.addi %0, %arg1 : i32
    %c0_i32 = arith.constant 0 : i32
    %c0_i32_0 = arith.constant 0 : i32
    return %c0_i32, %1 : i32, i32
  }
  func.func @transform_1(%arg0: i32, %arg1: i32) -> (i32, i32) {
    %c1_i32 = arith.constant 1 : i32
    %0 = arith.muli %arg0, %c1_i32 : i32
    %1 = arith.addi %0, %arg1 : i32
    %c0_i32 = arith.constant 0 : i32
    %c0_i32_0 = arith.constant 0 : i32
    return %c0_i32, %1 : i32, i32
  }
  func.func @transform_2(%arg0: i32, %arg1: i32) -> (i32, i32, i32) {
    %c0_i32 = arith.constant 0 : i32
    %c0_i32_0 = arith.constant 0 : i32
    %c0_i32_1 = arith.constant 0 : i32
    return %arg0, %c0_i32, %c0_i32_0 : i32, i32, i32
  }
}

</mosaic_0001>

<bundles_post_ra>
// kernel: cb_loss.1
= control target key start
LH: loop header
LB: loop body
LE: loop exit
PB: predicated region body
PF: predicated region fallthrough
CT: control target
= control target key end

     0   :  { %s551_s9 = smov 0   ;;  %s553_s10 = smov 0   ;;  %s678_s0 = inlined_call_operand.vmem [shape: f32[24,256], index: 0, kind: input, shape index: {}]   ;;  %s679_s1 = inlined_call_operand.vmem [shape: s32[8,256], index: 1, kind: input, shape index: {}]   ;;  %s680_s2 = inlined_call_operand.vmem [shape: f32[2,8,128], index: 2, kind: output, shape index: {}]  }
   0x1   :  { %s555_s11 = smov 0   ;;  %s557_s12 = smov 0  }
   0x2   :  { %s559_s13 = smov 0  }
   0x3 LB: > { %s24_s14 = sadd.s32 1, %s529_s12  ;;  %p40_p1 = scmp.ne.s32.totalorder %s521_s10, %s517_s9  ;;  %s533_s13 = sphi %s559_s13, %s12_s13   ;;  %s529_s12 = sphi %s557_s12, %s688_s12   ;;  %s525_s11 = sphi %s555_s11, %s687_s11   ;;  %s521_s10 = sphi %s553_s10, %s686_s10   ;;  %s517_s9 = sphi %s551_s9, %s685_s9  }
   0x4   : > { %p26_p0 = scmp.ge.s32.totalorder %s24_s14, 2  ;;  %p41_p2 = scmp.eq.s32.totalorder %s533_s13, 0 }
   0x5   : > { %s33_s16 = sadd.s32 1, %s521_s10  ;;  %p425_p5 = scmp.ge.s32.totalorder %s533_s13, 2 }
   0x6   : > { %s690_s14 = smov (%p26_p0, %s24_s14), 0  ;;  %p42_p3 = por %p41_p2, %p40_p1 }
   0x7   : > { %s30_s15 = ssub.s32 %s529_s12, %s690_s14  ;;  %120 = sbr.rel (%p425_p5) target bundleno = 18 (0x12), region = 16 }
   0x8   : > { %p31_p4 = scmp.eq.s32.totalorder %s30_s15, 0 }
   0xa   : > { %s586_s17 = scalar_select %p31_p4, %s521_s10, %s33_s16  }
   0xc   : > { %123 = sbr.rel (!%p42_p3) target bundleno = 18 (0x12), region = 20  ;;  %s125_s18 = sand.u32 (%p42_p3), 1, %s521_s10  }
   0xd   : > { %s426_s19 = sshll.u32 (%p42_p3), %s529_s12, 3  ;;  %s432_s20 = smul.u32 (%p42_p3), 24, %s125_s18 }
   0xe   : > { %s130_s23 = scalar_lea.vmem (%p42_p3), %s678_s0, %s426_s19 }
   0xf   : > { %v163_v0 = vld [vmem:[%s130_s23] sm:$0xff] (%p42_p3)  ;;  %v165_v1 = vld [vmem:[%s130_s23 + $0x10] sm:$0xff] (%p42_p3)  ;;  %s127_s24 = scalar_lea.vmem (%p42_p3), [#allocation2], %s432_s20 }
  0x10   : > { %v167_v2 = vld [vmem:[%s130_s23 + $0x20] sm:$0xff] (%p42_p3)  ;;  %164 = vst [vmem:[%s127_s24] sm:$0xff] (%p42_p3), %v163_v0  ;;  %166 = vst [vmem:[%s127_s24 + $0x8] sm:$0xff] (%p42_p3), %v165_v1 }
  0x11   : > { %168 = vst [vmem:[%s127_s24 + $0x10] sm:$0xff] %v167_v2 }
  0x12 PF: > { %p427_p6 = scmp.ge.s32.totalorder %s533_s13, 1  ;;  %p182_p7 = scmp.lt.s32.totalorder %s533_s13, 3 }
  0x14   : > { %p183_p8 = pnand %p427_p6, %p182_p7 }
  0x15   : > { %s189_s25 = sand.u32 (!%p183_p8), 1, %s517_s9   ;;  %p216_p9 = scmp.lt.s32.totalorder (!%p183_p8), %s525_s11, 1 }
  0x16   : > { %186 = sbr.rel (%p183_p8) target bundleno = 424 (0x1a8), region = 62 }
  0x17   : > { %s433_s26 = smul.u32 (!%p183_p8), 24, %s189_s25 }
  0x19   : > { %s191_s27 = scalar_lea.vmem (!%p183_p8), [#allocation2], %s433_s26 }
  0x1b   : > { %v237_v3 = vld [vmem:[%s191_s27] sm:$0xff]  ;;  %v597_v4 = vld [vmem:[%s191_s27 + $0x8] sm:$0xff]  ;;  %v599_v5 = vld [vmem:[%s191_s27 + $0x10] sm:$0xff]  ;;  %s692_s11 = smov (!%p216_p9, %s525_s11), 1  ;;  %vm327_vm9 = vcmask 7168  }
  0x1c   : > { %v238_v6 = vand.u32 2147483647, %v237_v3  ;;  %v267_v7 = vand.u32 2147483647, %v597_v4  ;;  %v296_v8 = vand.u32 2147483647, %v599_v5 }
  0x1d   : > { %s428_s28 = sshll.u32 %s692_s11, 3  ;;  %v251_v27 = vmax.f32 %v237_v3, 0.0  ;;  %vm258_vm0 = vcmp.ge.f32.partialorder %v237_v3, 0.0  ;;  %v280_v29 = vmax.f32 %v597_v4, 0.0  ;;  %vm287_vm1 = vcmp.ge.f32.partialorder %v597_v4, 0.0 }
  0x1e   : > { %v239_v9 = vsub.f32 0.0, %v238_v6  ;;  %v268_v10 = vsub.f32 0.0, %v267_v7  ;;  %v297_v13 = vsub.f32 0.0, %v296_v8  ;;  %s219_s3 = scalar_lea.vmem %s679_s1, %s428_s28  ;;  %v309_v31 = vmax.f32 %v599_v5, 0.0  ;;  %s224_s7 = scalar_lea.vmem %s680_s2, %s428_s28 }
  0x1f   : > { %v613_v23 = vld [vmem:[%s219_s3] sm:$0xff]  ;;  %v252_v37 = vsub.f32 %v251_v27, %v237_v3  ;;  %vm316_vm6 = vcmp.ge.f32.partialorder %v599_v5, 0.0  ;;  %v281_v47 = vsub.f32 %v280_v29, %v597_v4 }
  0x20   : > { %v240_v11 = vmul.f32 1.442695, %v239_v9  ;;  %v269_v12 = vmul.f32 1.442695, %v268_v10  ;;  %v298_v14 = vmul.f32 1.442695, %v297_v13  ;;  %v310_v48 = vsub.f32 %v309_v31, %v599_v5 }
  0x21   : > { %vm231_vm2 = vcmp.eq.s32.totalorder %v613_v23, 0  ;;  %vm233_vm3 = vcmp.eq.s32.totalorder %v613_v23, 1  ;;  %vm235_vm4 = vcmp.eq.s32.totalorder %v613_v23, 2 }
  0x22   : > { %477 = vpow2.f32 %v240_v11  ;;  %v254_v41 = vsel %vm231_vm2, 0.0, %v237_v3  ;;  %v283_v60 = vsel %vm233_vm3, 0.0, %v597_v4  ;;  %v312_v6 = vsel %vm235_vm4, 0.0, %v599_v5 }
  0x23   : > { %479 = vpow2.f32 %v269_v12  ;;  %v535_v4 = vmov 0.0  }
  0x24   : > { %481 = vpow2.f32 %v298_v14  ;;  %v232_v11 = vsel %vm231_vm2, 0.83616865, %v535_v4 }
  0x25   : > { %v234_v5 = vsel %vm233_vm3, 1.3465565, %v232_v11 }
  0x2f   : > { %v478_v15 = vpop.eup %477 }
  0x30   : > { %v480_v16 = vpop.eup %479  ;;  %v242_v17 = vadd.f32 1.0, %v478_v15  ;;  %v245_v21 = vmul.f32 -0.5, %v478_v15  ;;  %v248_v26 = vand.u32 2147483647, %v478_v15  ;;  %v259_v33 = vsel %vm258_vm0, 1.0, %v478_v15 }
  0x31   : > { %v271_v18 = vadd.f32 1.0, %v480_v16  ;;  %v482_v19 = vpop.eup %481  ;;  %v274_v22 = vmul.f32 -0.5, %v480_v16  ;;  %v277_v30 = vand.u32 2147483647, %v480_v16  ;;  %v288_v43 = vsel %vm287_vm1, 1.0, %v480_v16 }
  0x32   : > { %483 = vlog2.f32 %v242_v17  ;;  %v300_v20 = vadd.f32 1.0, %v482_v19  ;;  %v246_v24 = vadd.f32 1.0, %v245_v21  ;;  %v303_v25 = vmul.f32 -0.5, %v482_v19 }
  0x33   : > { %485 = vrcp.f32 %v242_v17  ;;  %v275_v28 = vadd.f32 1.0, %v274_v22  ;;  %vm621_vm5 = vcmp.lt.f32.partialorder %v248_v26, 0.0004427343  ;;  %v306_v38 = vand.u32 2147483647, %v482_v19 }
  0x34   : > { %487 = vlog2.f32 %v271_v18  ;;  %v247_v32 = vmul.f32 %v478_v15, %v246_v24  ;;  %v304_v34 = vadd.f32 1.0, %v303_v25  ;;  %vm630_vm7 = vcmp.lt.f32.partialorder %v277_v30, 0.0004427343 }
  0x35   : > { %489 = vrcp.f32 %v271_v18  ;;  %v276_v42 = vmul.f32 %v480_v16, %v275_v28  ;;  %v317_v53 = vsel %vm316_vm6, 1.0, %v482_v19  ;;  %vm307_vm8 = vcmp.lt.f32.partialorder %v306_v38, 0.0004427343 }
  0x36   : > { %491 = vlog2.f32 %v300_v20  ;;  %v305_v52 = vmul.f32 %v482_v19, %v304_v34  ;;  %v236_v21 = vsel %vm235_vm4, 0.81727487, %v234_v5 }
  0x37   : > { %493 = vrcp.f32 %v300_v20 }
  0x3f   : > { %v484_v35 = vpop.eup %483 }
  0x40   : > { %v486_v39 = vpop.eup %485  ;;  %v244_v40 = vmul.f32 0.6931472, %v484_v35 }
  0x41   : > { %v488_v44 = vpop.eup %487  ;;  %v260_v45 = vmul.f32 %v486_v39, %v259_v33 }
  0x42   : > { %v490_v49 = vpop.eup %489  ;;  %v250_v50 = vsel %vm621_vm5, %v247_v32, %v244_v40  ;;  %v273_v51 = vmul.f32 0.6931472, %v488_v44 }
  0x43   : > { %v492_v54 = vpop.eup %491  ;;  %v253_v55 = vadd.f32 %v252_v37, %v250_v50  ;;  %v261_v56 = vsub.f32 1.0, %v260_v45  ;;  %v289_v57 = vmul.f32 %v490_v49, %v288_v43 }
  0x44   : > { %v494_v58 = vpop.eup %493  ;;  %v279_v59 = vsel %vm630_vm7, %v276_v42, %v273_v51  ;;  %v302_v61 = vmul.f32 0.6931472, %v492_v54 }
  0x45   : > { %v255_v62 = vadd.f32 %v254_v41, %v253_v55  ;;  %v262_v63 = vsel %vm231_vm2, %v261_v56, %v260_v45  ;;  %v282_v0 = vadd.f32 %v281_v47, %v279_v59  ;;  %v290_v1 = vsub.f32 1.0, %v289_v57 }
  0x46   : > { %v263_v2 = vmul.f32 %v262_v63, %v262_v63  ;;  %v308_v3 = vsel %vm307_vm8, %v305_v52, %v302_v61  ;;  %v318_v7 = vmul.f32 %v494_v58, %v317_v53 }
  0x47   : > { %v284_v8 = vadd.f32 %v283_v60, %v282_v0  ;;  %v291_v9 = vsel %vm233_vm3, %v290_v1, %v289_v57  ;;  %v311_v10 = vadd.f32 %v310_v48, %v308_v3 }
  0x48   : > { %v264_v12 = vmul.f32 %v263_v2, %v255_v62  ;;  %v292_v13 = vmul.f32 %v291_v9, %v291_v9  ;;  %v319_v14 = vsub.f32 1.0, %v318_v7 }
  0x49   : > { %v313_v15 = vadd.f32 %v312_v6, %v311_v10 }
  0x4a   : > { %v293_v16 = vmul.f32 %v292_v13, %v284_v8  ;;  %v320_v17 = vsel %vm235_vm4, %v319_v14, %v318_v7 }
  0x4b   : > { %v321_v18 = vmul.f32 %v320_v17, %v320_v17 }
  0x4c   : > { %v294_v19 = vadd.f32 %v293_v16, %v264_v12 }
  0x4d   : > { %v322_v20 = vmul.f32 %v321_v18, %v313_v15 }
  0x4f   : > { %v323_v22 = vadd.f32 %v322_v20, %v294_v19 }
  0x51   : > { %v324_v24 = vmul.f32 %v323_v22, %v236_v21 }
  0x53   : > { %325 = vadd.xlane.f32.xlu0 %v324_v24 }
  0xdc   : > { %v326_v25 = vpop.xlane.xlu0 %325 }
  0xdd   : > { %v328_v26 = vsel %vm327_vm9, %v326_v25, 0.0 }
  0xde   : > { %329 = vadd.xlane.f32.xlu0 %v328_v26 }
 0x167   : > { %v330_v27 = vpop.xlane.xlu0 %329 }
 0x168   : > { %v331_v28 = vrot.slane %v330_v27, 4 }
 0x16a   : > { %v332_v29 = vadd.f32 %v331_v28, %v330_v27 }
 0x16c   : > { %v333_v30 = vrot.slane %v332_v29, 2 }
 0x16e   : > { %v334_v31 = vadd.f32 %v333_v30, %v332_v29 }
 0x170   : > { %v335_v32 = vrot.slane %v334_v31, 1 }
 0x172   : > { %v336_v33 = vadd.f32 %v335_v32, %v334_v31 }
 0x174   : > { %434 = vpush %v336_v33 }
 0x1a5   : > { %s435_s4 = spop %434 }
 0x1a6   : > { %v339_v23 = vstv %s435_s4 }
 0x1a7   : > { %341 = vst [vmem:[%s224_s7] sm:$0xff] %v339_v23 }
 0x1a8 PF: > { %s12_s13 = sadd.s32 1, %s533_s13   ;;  %s685_s9 = smov %s521_s10 }
 0x1a9   : > { %p9_p10 = scmp.ge.s32.totalorder %s12_s13, 4   ;;  %s686_s10 = smov %s586_s17 }
 0x1aa   : > { %s687_s11 = smov %s529_s12  ;;  %s688_s12 = smov %s690_s14 }
 0x1ab   :  { %11 = sbr.rel (!%p9_p10) target bundleno = 3 (0x3), region = 108 }

</bundles_post_ra>
